<compile_context>
chip_gen: v7x
topology: tpu7x:2x2x1
jax: 0.10.0
libtpu: 0.0.40
codegen_flags: <defaults>
</compile_context>

<pallas_src>
import functools
import math

import jax
import jax.numpy as jnp
from jax.experimental import pallas as pl
from jax.experimental.pallas import tpu as pltpu


def _round_up(x, m):
    return (x + m - 1) // m * m


def _sublane_multiple(dtype):
    # f32 -> 8, bf16/f16 -> 16, int8/fp8 -> 32 (sublane packing requirement).
    return max(8, 32 // dtype.itemsize)


def _default_block_budget_bytes():
    # ~4 MiB per input block on v7x (64 MiB VMEM), ~8 MiB on v5e/v6e (128 MiB).
    try:
        info = pltpu.get_tpu_info()
        vmem = getattr(info, "vmem_capacity_bytes", None)
        if vmem is not None and vmem >= 96 * 1024 * 1024:
            return 8 * 1024 * 1024
    except Exception:
        pass
    return 4 * 1024 * 1024


def _tversky_kernel(pred_ref, tgt_ref, out_ref, s_pt, s_p, s_t,
                    *, alpha, beta, smooth, tail):
    k = pl.program_id(1)              # spatial (reduction) axis — innermost
    last = pl.num_programs(1) - 1

    @pl.when(k == 0)
    def _():
        s_pt[...] = jnp.zeros_like(s_pt)
        s_p[...] = jnp.zeros_like(s_p)
        s_t[...] = jnp.zeros_like(s_t)

    x = pred_ref[...].astype(jnp.float32)
    t = tgt_ref[...].astype(jnp.float32)
    # sigmoid(x) = 0.5*tanh(0.5*x) + 0.5 : one EUP op + 2 cheap VPU ops.
    p = 0.5 * jnp.tanh(0.5 * x) + 0.5

    def _accumulate(pv, tv):
        # Raw sums only; alpha/beta are folded per-row in the finalize,
        # saving 2 vmul + 1 vadd per vreg in the hot loop.
        s_pt[...] += jnp.sum(pv * tv, axis=-1, keepdims=True)
        s_p[...] += jnp.sum(pv, axis=-1, keepdims=True)
        s_t[...] += jnp.sum(tv, axis=-1, keepdims=True)

    if tail is None:
        # Spatial extent divides the tile (or is a single full-extent block):
        # no masking needed anywhere.
        _accumulate(p, t)
    else:
        # Ragged spatial tail: mask out-of-range columns on the LAST block only
        # (both p and t must be zeroed so they contribute 0 to every sum).
        @pl.when(k != last)
        def _():
            _accumulate(p, t)

        @pl.when(k == last)
        def _():
            col = jax.lax.broadcasted_iota(jnp.int32, p.shape, 1)
            valid = col < tail
            _accumulate(jnp.where(valid, p, 0.0), jnp.where(valid, t, 0.0))

    @pl.when(k == last)
    def _():
        r_pt = s_pt[...]
        r_p = s_p[...]
        r_t = s_t[...]
        # tp + a*fp + b*fn == (1 - a - b)*sum(p*t) + a*sum(p) + b*sum(t)
        denom = r_pt * (1.0 - alpha - beta) + alpha * r_p + beta * r_t + smooth
        out_ref[...] = 1.0 - (r_pt + smooth) / denom


def tversky_loss(predictions, targets, *, alpha=0.3, beta=0.7, smooth=1e-06,
                 reduction="mean", block_budget_bytes=None):
    """Tversky loss matching the PyTorch reference semantics.

    predictions, targets: (B, C, *spatial). Any dtype (bf16/f32/int targets);
    no conversion or padding is done at the HBM boundary.
    """
    B, C = predictions.shape[0], predictions.shape[1]
    S = 1
    for d in predictions.shape[2:]:
        S *= d
    BC = B * C

    pred_flat = predictions.reshape(BC, S)
    tgt_flat = targets.reshape(BC, S)

    mult = max(_sublane_multiple(pred_flat.dtype),
               _sublane_multiple(tgt_flat.dtype))

    # ---- row tiling ----
    # Multiple of the sublane packing; capped; and at most half the rows so the
    # "parallel" axis has >= 2 steps whenever possible (v7x has 2 TensorCores).
    ROW_CAP = 256
    bc_rounded = _round_up(BC, mult)
    rows_t = max(mult, min(ROW_CAP, _round_up(-(-bc_rounded // 2), mult)))

    # ---- spatial tiling against a per-input-block VMEM budget ----
    if block_budget_bytes is None:
        block_budget_bytes = _default_block_budget_bytes()
    in_itemsize = max(pred_flat.dtype.itemsize, tgt_flat.dtype.itemsize)
    ts_max = max(128, (block_budget_bytes // (rows_t * in_itemsize)) // 128 * 128)

    if S <= ts_max:
        TS = S                 # single full-extent spatial block (any alignment)
        n_spatial = 1
        tail = None
    else:
        n_spatial = math.ceil(S / ts_max)
        TS = _round_up(math.ceil(S / n_spatial), 128)
        n_spatial = math.ceil(S / TS)
        rem = S - (n_spatial - 1) * TS
        tail = None if rem == TS else rem

    grid = (math.ceil(BC / rows_t), n_spatial)

    kernel = functools.partial(_tversky_kernel, alpha=float(alpha),
                               beta=float(beta), smooth=float(smooth),
                               tail=tail)

    # Need-based VMEM reservation (double-buffered inputs dominate).
    vmem_need = 2 * rows_t * TS * (pred_flat.dtype.itemsize
                                   + tgt_flat.dtype.itemsize)
    vmem_need += 2 * rows_t * 4 + 3 * rows_t * 4
    vmem_limit = None
    if vmem_need > 12 * 1024 * 1024:   # v5e's default scoped limit is 16 MiB
        vmem_limit = min(vmem_need + 8 * 1024 * 1024, 56 * 1024 * 1024)

    per_class = pl.pallas_call(
        kernel,
        out_shape=jax.ShapeDtypeStruct((BC, 1), jnp.float32),
        grid_spec=pltpu.PrefetchScalarGridSpec(
            num_scalar_prefetch=0,
            grid=grid,
            in_specs=[
                pl.BlockSpec((rows_t, TS), lambda i, k: (i, k)),
                pl.BlockSpec((rows_t, TS), lambda i, k: (i, k)),
            ],
            out_specs=pl.BlockSpec((rows_t, 1), lambda i, k: (i, 0)),
            scratch_shapes=[
                pltpu.VMEM((rows_t, 1), jnp.float32),
                pltpu.VMEM((rows_t, 1), jnp.float32),
                pltpu.VMEM((rows_t, 1), jnp.float32),
            ],
        ),
        compiler_params=pltpu.CompilerParams(
            dimension_semantics=("parallel", "arbitrary"),
            vmem_limit_bytes=vmem_limit,
        ),
    )(pred_flat, tgt_flat)

    per_class = per_class.reshape(B, C)

    if reduction == "mean":
        return jnp.mean(per_class)
    elif reduction == "sum":
        return jnp.sum(per_class)
    else:
        return per_class


def _reference(predictions, targets, alpha=0.3, beta=0.7, smooth=1e-06,
               reduction="mean"):
    p = jax.nn.sigmoid(predictions.astype(jnp.float32))
    t = targets.astype(jnp.float32)
    B, C = p.shape[0], p.shape[1]
    pf = p.reshape(B, C, -1)
    tf = t.reshape(B, C, -1)
    tp = jnp.sum(pf * tf, axis=2)
    fp = jnp.sum(pf * (1 - tf), axis=2)
    fn = jnp.sum((1 - pf) * tf, axis=2)
    idx = (tp + smooth) / (tp + alpha * fp + beta * fn + smooth)
    loss = 1 - idx
    if reduction == "mean":
        return jnp.mean(loss)
    elif reduction == "sum":
        return jnp.sum(loss)
    return loss


if __name__ == "__main__":
    key = jax.random.PRNGKey(0)
    k1, k2, k3, k4, k5, k6 = jax.random.split(key, 6)

    # Test 1: B=2, C=4, 16x16 spatial (aligned), f32, mean reduction.
    B, C, H, W = 2, 4, 16, 16
    predictions = jax.random.normal(k1, (B, C, H, W), dtype=jnp.float32)
    targets = (jax.random.uniform(k2, (B, C, H, W)) > 0.5).astype(jnp.float32)
    loss = jax.block_until_ready(tversky_loss(predictions, targets))
    ref = _reference(predictions, targets)
    assert jnp.allclose(loss, ref, atol=1e-5, rtol=1e-5), (loss, ref)

    # Test 2: irregular spatial size (15x13) with a forced-small block budget
    # so the kernel exercises the tiled path + in-kernel tail masking.
    H2, W2 = 15, 13
    pred2 = jax.random.normal(k3, (B, C, H2, W2), dtype=jnp.float32)
    tgt2 = (jax.random.uniform(k4, (B, C, H2, W2)) > 0.5).astype(jnp.float32)
    loss2 = jax.block_until_ready(
        tversky_loss(pred2, tgt2, reduction="none", block_budget_bytes=4096))
    ref2 = _reference(pred2, tgt2, reduction="none")
    assert jnp.allclose(loss2, ref2, atol=1e-5, rtol=1e-5), (loss2, ref2)

    # Test 3: bf16 predictions (no f32 forcing at the boundary), BC not a
    # multiple of the row tile (partial edge block), sum reduction.
    B3, C3, H3, W3 = 2, 3, 9, 7
    pred3 = jax.random.normal(k5, (B3, C3, H3, W3)).astype(jnp.bfloat16)
    tgt3 = (jax.random.uniform(k6, (B3, C3, H3, W3)) > 0.5).astype(jnp.float32)
    loss3 = jax.block_until_ready(tversky_loss(pred3, tgt3, reduction="sum"))
    ref3 = _reference(pred3, tgt3, reduction="sum")
    assert jnp.allclose(loss3, ref3, atol=1e-4, rtol=1e-4), (loss3, ref3)

    print("KERNEL_OK")
</pallas_src>

<mosaic_0001>
module attributes {stable_mosaic.version = 11 : i64} {
  func.func @_tversky_kernel(%arg0: i32, %arg1: i32, %arg2: memref<8x256xf32, #tpu.memory_space<vmem>>, %arg3: memref<8x256xf32, #tpu.memory_space<vmem>>, %arg4: memref<8x1xf32, #tpu.memory_space<vmem>>, %arg5: memref<8x1xf32, #tpu.memory_space<vmem>>, %arg6: memref<8x1xf32, #tpu.memory_space<vmem>>, %arg7: memref<8x1xf32, #tpu.memory_space<vmem>>) attributes {dimension_semantics = [#tpu.dimension_semantics<parallel>, #tpu.dimension_semantics<arbitrary>], iteration_bounds = array<i64: 1, 1>, scalar_prefetch = 0 : i64, scratch_operands = 3 : i64, tpu.core_type = #tpu.core_type<tc>, window_params = [{transform_indices = @transform_0, window_bounds = array<i64: 8, 256>}, {transform_indices = @transform_1, window_bounds = array<i64: 8, 256>}, {transform_indices = @transform_2, window_bounds = array<i64: 8, 1>}]} {
    %c0_i32 = arith.constant 0 : i32
    %0 = arith.cmpi eq, %arg1, %c0_i32 : i32
    %1 = arith.extui %0 : i1 to i32
    %c0_i32_0 = arith.constant 0 : i32
    %2 = arith.cmpi ne, %1, %c0_i32_0 : i32
    scf.if %2 {
      %cst_23 = arith.constant 0.000000e+00 : f32
      %31 = vector.broadcast %cst_23 : f32 to vector<8x1xf32>
      %c0_24 = arith.constant 0 : index
      %c0_25 = arith.constant 0 : index
      %32 = vector.load %arg5[%c0_24, %c0_25] : memref<8x1xf32, #tpu.memory_space<vmem>>, vector<8x1xf32>
      tpu.vector_store %arg5[%c0_24, %c0_25], %31 {strides = array<i32>} : memref<8x1xf32, #tpu.memory_space<vmem>>, vector<8x1xf32>,
      %cst_26 = arith.constant 0.000000e+00 : f32
      %33 = vector.broadcast %cst_26 : f32 to vector<8x1xf32>
      %c0_27 = arith.constant 0 : index
      %c0_28 = arith.constant 0 : index
      %34 = vector.load %arg6[%c0_27, %c0_28] : memref<8x1xf32, #tpu.memory_space<vmem>>, vector<8x1xf32>
      tpu.vector_store %arg6[%c0_27, %c0_28], %33 {strides = array<i32>} : memref<8x1xf32, #tpu.memory_space<vmem>>, vector<8x1xf32>,
      %cst_29 = arith.constant 0.000000e+00 : f32
      %35 = vector.broadcast %cst_29 : f32 to vector<8x1xf32>
      %c0_30 = arith.constant 0 : index
      %c0_31 = arith.constant 0 : index
      %36 = vector.load %arg7[%c0_30, %c0_31] : memref<8x1xf32, #tpu.memory_space<vmem>>, vector<8x1xf32>
      tpu.vector_store %arg7[%c0_30, %c0_31], %35 {strides = array<i32>} : memref<8x1xf32, #tpu.memory_space<vmem>>, vector<8x1xf32>,
    } else {
    }
    %c0 = arith.constant 0 : index
    %c0_1 = arith.constant 0 : index
    %3 = vector.load %arg2[%c0, %c0_1] : memref<8x256xf32, #tpu.memory_space<vmem>>, vector<8x256xf32>
    %c0_2 = arith.constant 0 : index
    %c0_3 = arith.constant 0 : index
    %4 = vector.load %arg3[%c0_2, %c0_3] : memref<8x256xf32, #tpu.memory_space<vmem>>, vector<8x256xf32>
    %cst = arith.constant 5.000000e-01 : f32
    %5 = vector.broadcast %cst : f32 to vector<8x256xf32>
    %6 = arith.mulf %5, %3 : vector<8x256xf32>
    %7 = math.tanh %6 : vector<8x256xf32>
    %cst_4 = arith.constant 5.000000e-01 : f32
    %8 = vector.broadcast %cst_4 : f32 to vector<8x256xf32>
    %9 = arith.mulf %8, %7 : vector<8x256xf32>
    %cst_5 = arith.constant 5.000000e-01 : f32
    %10 = vector.broadcast %cst_5 : f32 to vector<8x256xf32>
    %11 = arith.addf %9, %10 : vector<8x256xf32>
    %c0_6 = arith.constant 0 : index
    %c0_7 = arith.constant 0 : index
    %12 = vector.load %arg5[%c0_6, %c0_7] : memref<8x1xf32, #tpu.memory_space<vmem>>, vector<8x1xf32>
    %13 = arith.mulf %11, %4 : vector<8x256xf32>
    %cst_8 = arith.constant dense<0.000000e+00> : vector<8xf32>
    %14 = vector.multi_reduction <add>, %13, %cst_8 [1] : vector<8x256xf32> to vector<8xf32>
    %15 = vector.shape_cast %14 : vector<8xf32> to vector<8x1xf32>
    %16 = arith.addf %12, %15 : vector<8x1xf32>
    %c0_9 = arith.constant 0 : index
    %c0_10 = arith.constant 0 : index
    %17 = vector.load %arg5[%c0_9, %c0_10] : memref<8x1xf32, #tpu.memory_space<vmem>>, vector<8x1xf32>
    tpu.vector_store %arg5[%c0_9, %c0_10], %16 {strides = array<i32>} : memref<8x1xf32, #tpu.memory_space<vmem>>, vector<8x1xf32>,
    %c0_11 = arith.constant 0 : index
    %c0_12 = arith.constant 0 : index
    %18 = vector.load %arg6[%c0_11, %c0_12] : memref<8x1xf32, #tpu.memory_space<vmem>>, vector<8x1xf32>
    %cst_13 = arith.constant dense<0.000000e+00> : vector<8xf32>
    %19 = vector.multi_reduction <add>, %11, %cst_13 [1] : vector<8x256xf32> to vector<8xf32>
    %20 = vector.shape_cast %19 : vector<8xf32> to vector<8x1xf32>
    %21 = arith.addf %18, %20 : vector<8x1xf32>
    %c0_14 = arith.constant 0 : index
    %c0_15 = arith.constant 0 : index
    %22 = vector.load %arg6[%c0_14, %c0_15] : memref<8x1xf32, #tpu.memory_space<vmem>>, vector<8x1xf32>
    tpu.vector_store %arg6[%c0_14, %c0_15], %21 {strides = array<i32>} : memref<8x1xf32, #tpu.memory_space<vmem>>, vector<8x1xf32>,
    %c0_16 = arith.constant 0 : index
    %c0_17 = arith.constant 0 : index
    %23 = vector.load %arg7[%c0_16, %c0_17] : memref<8x1xf32, #tpu.memory_space<vmem>>, vector<8x1xf32>
    %cst_18 = arith.constant dense<0.000000e+00> : vector<8xf32>
    %24 = vector.multi_reduction <add>, %4, %cst_18 [1] : vector<8x256xf32> to vector<8xf32>
    %25 = vector.shape_cast %24 : vector<8xf32> to vector<8x1xf32>
    %26 = arith.addf %23, %25 : vector<8x1xf32>
    %c0_19 = arith.constant 0 : index
    %c0_20 = arith.constant 0 : index
    %27 = vector.load %arg7[%c0_19, %c0_20] : memref<8x1xf32, #tpu.memory_space<vmem>>, vector<8x1xf32>
    tpu.vector_store %arg7[%c0_19, %c0_20], %26 {strides = array<i32>} : memref<8x1xf32, #tpu.memory_space<vmem>>, vector<8x1xf32>,
    %c0_i32_21 = arith.constant 0 : i32
    %28 = arith.cmpi eq, %arg1, %c0_i32_21 : i32
    %29 = arith.extui %28 : i1 to i32
    %c0_i32_22 = arith.constant 0 : i32
    %30 = arith.cmpi ne, %29, %c0_i32_22 : i32
    scf.if %30 {
      %c0_23 = arith.constant 0 : index
      %c0_24 = arith.constant 0 : index
      %31 = vector.load %arg5[%c0_23, %c0_24] : memref<8x1xf32, #tpu.memory_space<vmem>>, vector<8x1xf32>
      %c0_25 = arith.constant 0 : index
      %c0_26 = arith.constant 0 : index
      %32 = vector.load %arg6[%c0_25, %c0_26] : memref<8x1xf32, #tpu.memory_space<vmem>>, vector<8x1xf32>
      %c0_27 = arith.constant 0 : index
      %c0_28 = arith.constant 0 : index
      %33 = vector.load %arg7[%c0_27, %c0_28] : memref<8x1xf32, #tpu.memory_space<vmem>>, vector<8x1xf32>
      %cst_29 = arith.constant 0.000000e+00 : f32
      %34 = vector.broadcast %cst_29 : f32 to vector<8x1xf32>
      %35 = arith.mulf %31, %34 : vector<8x1xf32>
      %cst_30 = arith.constant 3.000000e-01 : f32
      %36 = vector.broadcast %cst_30 : f32 to vector<8x1xf32>
      %37 = arith.mulf %36, %32 : vector<8x1xf32>
      %38 = arith.addf %35, %37 : vector<8x1xf32>
      %cst_31 = arith.constant 0.699999988 : f32
      %39 = vector.broadcast %cst_31 : f32 to vector<8x1xf32>
      %40 = arith.mulf %39, %33 : vector<8x1xf32>
      %41 = arith.addf %38, %40 : vector<8x1xf32>
      %cst_32 = arith.constant 9.99999997E-7 : f32
      %42 = vector.broadcast %cst_32 : f32 to vector<8x1xf32>
      %43 = arith.addf %41, %42 : vector<8x1xf32>
      %cst_33 = arith.constant 9.99999997E-7 : f32
      %44 = vector.broadcast %cst_33 : f32 to vector<8x1xf32>
      %45 = arith.addf %31, %44 : vector<8x1xf32>
      %46 = arith.divf %45, %43 : vector<8x1xf32>
      %cst_34 = arith.constant 1.000000e+00 : f32
      %47 = vector.broadcast %cst_34 : f32 to vector<8x1xf32>
      %48 = arith.subf %47, %46 : vector<8x1xf32>
      %c0_35 = arith.constant 0 : index
      %c0_36 = arith.constant 0 : index
      %49 = vector.load %arg4[%c0_35, %c0_36] : memref<8x1xf32, #tpu.memory_space<vmem>>, vector<8x1xf32>
      tpu.vector_store %arg4[%c0_35, %c0_36], %48 {strides = array<i32>} : memref<8x1xf32, #tpu.memory_space<vmem>>, vector<8x1xf32>,
    } else {
    }
    return
  }
  func.func @transform_0(%arg0: i32, %arg1: i32) -> (i32, i32) {
    %c0_i32 = arith.constant 0 : i32
    return %arg0, %arg1 : i32, i32
  }
  func.func @transform_1(%arg0: i32, %arg1: i32) -> (i32, i32) {
    %c0_i32 = arith.constant 0 : i32
    return %arg0, %arg1 : i32, i32
  }
  func.func @transform_2(%arg0: i32, %arg1: i32) -> (i32, i32) {
    %c0_i32 = arith.constant 0 : i32
    %c0_i32_0 = arith.constant 0 : i32
    return %arg0, %c0_i32 : i32, i32
  }
}

</mosaic_0001>

<bundles_post_ra>
// kernel: tpu_custom_call.1
= control target key start
LH: loop header
LB: loop body
LE: loop exit
PB: predicated region body
PF: predicated region fallthrough
CT: control target
= control target key end

     0   :  { %7 = vsyncpa [#allocation6], 0  ;;  %s208_s0 = inlined_call_operand.hbm [shape: f32[8,256], index: 0, kind: input, shape index: {}]   ;;  %s209_s1 = inlined_call_operand.hbm [shape: f32[8,256], index: 1, kind: input, shape index: {}]   ;;  %s210_s2 = inlined_call_operand.vmem [shape: f32[8,1], index: 2, kind: output, shape index: {}]  }
   0x1   :  { %8 = vsyncpa [#allocation8], 0  ;;  %s156_s9 = smov [#allocation5]   ;;  %s157_s11 = smov [#allocation7]  }
   0x2   :  { %s15_s10 = sshll.u32 %s156_s9, 4  ;;  %s25_s12 = sshll.u32 %s157_s11, 4  ;;  %s16_s10 = int_to_ptr.vmem [resolvable:$true] %s15_s10  ;;  %s26_s12 = int_to_ptr.vmem [resolvable:$true] %s25_s12 }
   0x3   :  { %s108_s15 = scalar_lea.hbm %s208_s0, 256 }
   0x4   :  { %p109_p0 = scmp.ne.s32.totalorder %s208_s0, %s108_s15  ;;  %p112_p1 = scmp.lt.u32.totalorder %s108_s15, %s208_s0 }
   0x6   :  { %p114_p2 = pnand %p112_p1, %p109_p0 }
   0x8   :  { %117 = shalt.err (!%p114_p2)
}
   0x9   :  { %s118_s20 = scalar_lea.vmem %s16_s10, 256  ;;  %p123_p4 = scmp.lt.s32.totalorder %s16_s10, %s16_s10 }
   0xa   :  { %p119_p3 = scmp.ne.s32.totalorder %s16_s10, %s118_s20  ;;  %p124_p5 = scmp.lt.s32.totalorder %s118_s20, %s118_s20 }
   0xc   :  { %p125_p6 = por %p124_p5, %p123_p4 }
   0xe   :  { %p126_p7 = pnand %p125_p6, %p119_p3 }
  0x10   :  { %129 = shalt.err (!%p126_p7)
}
  0x11   :  { %18 = dma.hbm_to_vmem [thread:$0]  %s208_s0, 256, %s16_s10, [#allocation6]  }
  0x12   :  { %s130_s25 = scalar_lea.hbm %s209_s1, 256 }
  0x13   :  { %p131_p8 = scmp.ne.s32.totalorder %s209_s1, %s130_s25  ;;  %p134_p9 = scmp.lt.u32.totalorder %s130_s25, %s209_s1 }
  0x15   :  { %p136_p10 = pnand %p134_p9, %p131_p8 }
  0x17   :  { %139 = shalt.err (!%p136_p10)
}
  0x18   :  { %s140_s30 = scalar_lea.vmem %s26_s12, 256  ;;  %p145_p12 = scmp.lt.s32.totalorder %s26_s12, %s26_s12 }
  0x19   :  { %p141_p11 = scmp.ne.s32.totalorder %s26_s12, %s140_s30  ;;  %p146_p13 = scmp.lt.s32.totalorder %s140_s30, %s140_s30 }
  0x1b   :  { %p147_p0 = por %p146_p13, %p145_p12 }
  0x1d   :  { %p148_p1 = pnand %p147_p0, %p141_p11 }
  0x1f   :  { %151 = shalt.err (!%p148_p1)
}
  0x20   :  { %28 = dma.hbm_to_vmem [thread:$0]  %s209_s1, 256, %s26_s12, [#allocation8]  }
  0x21   :  { %152 = dma.done.wait [#allocation6], 256  }
  0x22   :  { %153 = vsyncadd [#allocation6], 4294967040 }
  0x23   :  { %154 = dma.done.wait [#allocation8], 256  }
  0x24   :  { %155 = vsyncadd [#allocation8], 4294967040  ;;  %vm39_vm0 = vcmask 7168   ;;  %v158_v0 = vmov 0.0   ;;  %v43_v1 = vld [vmem:[#allocation5] sm:$0xff]  ;;  %v44_v2 = vld [vmem:[#allocation5 + $0x8] sm:$0xff] }
  0x25   :  { %40 = vst.msk [vmem:[#allocation2] sm:$0xff] %vm39_vm0, %v158_v0  ;;  %41 = vst.msk [vmem:[#allocation3] sm:$0xff] %vm39_vm0, %v158_v0  ;;  %v45_v3 = vld [vmem:[#allocation7] sm:$0xff]  ;;  %v46_v4 = vld [vmem:[#allocation7 + $0x8] sm:$0xff]  ;;  %v47_v5 = vmul.f32 0.5, %v43_v1  ;;  %v48_v6 = vmul.f32 0.5, %v44_v2 }
  0x26   :  { %42 = vst.msk [vmem:[#allocation4] sm:$0xff] %vm39_vm0, %v158_v0  ;;  %v71_v7 = vadd.f32 %v46_v4, %v45_v3 }
  0x27   :  { %102 = vtanh.f32 %v47_v5 }
  0x28   :  { %104 = vtanh.f32 %v48_v6  ;;  %72 = vadd.xlane.f32.xlu1 %v71_v7 }
  0x2c   :  { %v55_v21 = vld [vmem:[#allocation2] sm:$0xff]  ;;  %v64_v24 = vld [vmem:[#allocation3] sm:$0xff] }
  0x2d   :  { %v70_v18 = vld [vmem:[#allocation4] sm:$0xff] }
  0x31   :  { %v103_v8 = vpop.eup %102 }
  0x32   :  { %v105_v9 = vpop.eup %104  ;;  %v51_v10 = vmul.f32 0.5, %v103_v8 }
  0x33   :  { %v52_v11 = vmul.f32 0.5, %v105_v9 }
  0x34   :  { %v53_v12 = vadd.f32 0.5, %v51_v10 }
  0x35   :  { %v54_v13 = vadd.f32 0.5, %v52_v11 }
  0x36   :  { %v56_v14 = vmul.f32 %v53_v12, %v45_v3 }
  0x37   :  { %v57_v15 = vmul.f32 %v54_v13, %v46_v4  ;;  %v65_v17 = vadd.f32 %v54_v13, %v53_v12 }
  0x39   :  { %v58_v16 = vadd.f32 %v57_v15, %v56_v14 }
  0x3b   :  { %59 = vadd.xlane.f32.xlu0 %v58_v16 }
  0x3f   :  { %66 = vadd.xlane.f32.xlu0 %v65_v17 }
  0xb5   :  { %v73_v19 = vpop.xlane.xlu1 %72 }
  0xb6   :  { %v74_v20 = vadd.f32 %v73_v19, %v70_v18 }
  0xb8   :  { %75 = vst.msk [vmem:[#allocation4] sm:$0xff] %vm39_vm0, %v74_v20 }
  0xbf   :  { %v81_v28 = vld [vmem:[#allocation4] sm:$0xff] }
  0xc0   :  { %v85_v32 = vmul.f32 0.7, %v81_v28 }
  0xc8   :  { %v60_v22 = vpop.xlane.xlu0 %59 }
  0xc9   :  { %v61_v23 = vadd.f32 %v60_v22, %v55_v21 }
  0xcb   :  { %63 = vst.msk [vmem:[#allocation2] sm:$0xff] %vm39_vm0, %v61_v23 }
  0xcc   :  { %v67_v25 = vpop.xlane.xlu0 %66 }
  0xcd   :  { %v68_v26 = vadd.f32 %v67_v25, %v64_v24 }
  0xcf   :  { %69 = vst.msk [vmem:[#allocation3] sm:$0xff] %vm39_vm0, %v68_v26 }
  0xd2   :  { %v79_v27 = vld [vmem:[#allocation2] sm:$0xff] }
  0xd3   :  { %v82_v30 = vmul.f32 0.0, %v79_v27  ;;  %v88_v36 = vadd.f32 1e-06, %v79_v27 }
  0xd6   :  { %v80_v29 = vld [vmem:[#allocation3] sm:$0xff] }
  0xd7   :  { %v83_v31 = vmul.f32 0.3, %v80_v29 }
  0xd9   :  { %v84_v33 = vadd.f32 %v83_v31, %v82_v30 }
  0xdb   :  { %v86_v34 = vadd.f32 %v85_v32, %v84_v33 }
  0xdd   :  { %v87_v35 = vadd.f32 1e-06, %v86_v34 }
  0xdf   :  { %106 = vrcp.f32 %v87_v35 }
  0xe9   :  { %v107_v37 = vpop.eup %106 }
  0xea   :  { %v90_v38 = vmul.f32 %v107_v37, %v88_v36 }
  0xec   :  { %v91_v39 = vsub.f32 1.0, %v90_v38 }
  0xee   :  { %92 = vst.msk [vmem:[%s210_s2] sm:$0xff] %vm39_vm0, %v91_v39 }
  0xef   :  { %97 = vsyncpa [#allocation6], 1 }
  0xf0   :  { %98 = vsyncpa [#allocation8], 1 }

</bundles_post_ra>
